<compile_context>
chip_gen: v6e
topology: v6e:2x2x1
jax: 0.10.0
libtpu: 0.0.40
codegen_flags: <defaults>
</compile_context>

<pallas_src>
import math
import functools

import jax
import jax.numpy as jnp
from jax.experimental import pallas as pl
from jax.experimental.pallas import tpu as pltpu

NEG_INF = -1000000000.0     # module default neg_inf
PAD_COL_BIAS = -1e38        # additive bias for padded-out key columns
M_INIT = -1e30              # finite init for the running max (avoids inf-inf NaNs)


def _round_up(x, m):
    return ((x + m - 1) // m) * m


def _cdiv(a, b):
    return (a + b - 1) // b


def _device_kind():
    try:
        return jax.devices()[0].device_kind.lower()
    except Exception:
        return ""


def _choose_tiling(BH, H, T, S, N):
    """Pick (G, tq, tk, T_pad, S_pad).

    G heads are processed per grid step and packed into the lanes of the output
    slab (last dim G*N, targeting 128).  The f32 score/p working set G*tq*tk*4B
    is bounded; caps differ per TPU generation (see the review).
    """
    kind = _device_kind()
    if "v5 lite" in kind or "v5e" in kind:
        # v5e: 1 vst slot, no bf16 VALU, ~820 GB/s HBM -> smaller K tiles.
        tq_cap, tk_cap, budget = 256, 256, 1 << 20
    elif "v6" in kind:
        # v6e: 128 MiB VMEM, ~1.4 TB/s HBM -> larger tq halves K/V re-reads.
        tq_cap, tk_cap, budget = 512, 512, 2 << 20
    else:
        # v7x / default: 64 MiB VMEM, 3.2 TB/s HBM -> modest tiles.
        tq_cap, tk_cap, budget = 256, 512, 1 << 20

    target_g = max(1, 128 // max(N, 1))     # pack heads until G*N ~ 128 lanes
    divisors = [d for d in range(1, H + 1) if H % d == 0]
    G = max([d for d in divisors if d <= target_g] or [1])

    def pick(g):
        tq = min(_round_up(T, 8), tq_cap)
        s8 = _round_up(S, 8)
        if s8 <= tk_cap:
            tk = s8                         # single S tile (full extent -> legal)
        else:
            tk = tk_cap                     # multiple of 128
            while g * tq * tk * 4 > budget and tk > 128:
                tk //= 2
        while g * tq * tk * 4 > budget and tq > 64:
            tq = _round_up(tq // 2, 8)
        return tq, tk

    tq, tk = pick(G)
    # v7x: keep the parallel grid extent >= 2 so both TensorCores get work
    # (no-op on single-core v5e/v6e).
    while G > 1 and (BH // G) * _cdiv(T, tq) < 2:
        G = max(d for d in divisors if d < G)
        tq, tk = pick(G)

    return G, tq, tk, _round_up(T, tq), _round_up(S, tk)


def _make_sdpa_kernel(scale, bias_kinds, G, pv_bf16):
    """Flash-style SDPA kernel, specialized on which additive biases exist.

    bias_kinds: tuple of 'col' | 'ts' | 'gts' describing the leading bias refs:
      'col' : (G, tk)      key-only bias, broadcast over the tq rows
      'ts'  : (tq, tk)     bias shared by the G heads of the group
      'gts' : (G, tq, tk)  per-head bias
    """
    n_bias = len(bias_kinds)

    def kernel(*refs):
        bias_refs = refs[:n_bias]
        q_ref, k_ref, v_ref, o_ref, qs_sc, m_sc, l_sc, acc_sc = refs[n_bias:]
        si = pl.program_id(2)

        @pl.when(si == 0)
        def _init():
            # 1/sqrt(d_k) folded into q (G*tq*N elems), hoisted out of the S loop.
            qs_sc[...] = q_ref[...] * scale
            m_sc[...] = jnp.full(m_sc.shape, M_INIT, dtype=m_sc.dtype)
            l_sc[...] = jnp.zeros(l_sc.shape, dtype=l_sc.dtype)
            acc_sc[...] = jnp.zeros(acc_sc.shape, dtype=acc_sc.dtype)

        # QK^T contracting the shared head dim (no explicit k transpose);
        # operands stay in the input dtype, f32 accumulation on the MXU.
        scores = jnp.einsum("gtn,gsn->gts", qs_sc[...], k_ref[...],
                            preferred_element_type=jnp.float32)   # (G, tq, tk)

        for kind, b_ref in zip(bias_kinds, bias_refs):
            b = b_ref[...].astype(jnp.float32)                    # bf16 -> f32
            if kind == "col":
                scores = scores + b[:, None, :]
            elif kind == "ts":
                scores = scores + b[None, :, :]
            else:  # 'gts'
                scores = scores + b

        # Online softmax update.
        m_prev = m_sc[...]
        m_new = jnp.maximum(m_prev, jnp.max(scores, axis=-1, keepdims=True))
        alpha = jnp.exp(m_prev - m_new)
        p = jnp.exp(scores - m_new)                               # (G, tq, tk) f32
        l_sc[...] = alpha * l_sc[...] + jnp.sum(p, axis=-1, keepdims=True)

        v_blk = v_ref[...]
        if pv_bf16:
            # Single-pass bf16 MXU issue for the PV matmul, f32 accumulation.
            p_mm = p.astype(jnp.bfloat16)
            v_mm = v_blk.astype(jnp.bfloat16)
        else:
            p_mm = p if v_blk.dtype == jnp.float32 else p.astype(v_blk.dtype)
            v_mm = v_blk
        acc_sc[...] = alpha * acc_sc[...] + jnp.einsum(
            "gts,gsn->gtn", p_mm, v_mm, preferred_element_type=jnp.float32)
        m_sc[...] = m_new

        @pl.when(si == pl.num_programs(2) - 1)
        def _finalize():
            # Dropout (eval mode) on the probabilities is the identity.
            # Exact divide: runs once per (group, T tile), off the hot S loop.
            acc = acc_sc[...] * (1.0 / l_sc[...])                 # (G, tq, N)
            if G == 1:
                out = acc[0]
            else:
                # Pack the G heads into lanes -> lane-dense (tq, G*N) store.
                out = jnp.concatenate([acc[g] for g in range(G)], axis=-1)
            o_ref[...] = out.astype(o_ref.dtype)

    return kernel


@functools.partial(jax.jit, static_argnames=("ignore_value", "pv_bf16"))
def scaled_dot_product_attention(q, k, v, padding_mask=None, attn_mask=None,
                                 ignore_value=0, pv_bf16=True):
    """Pallas TPU implementation of ScaledDotProductAttention.forward (eval mode).

    q: [B, *, T, N]   k, v: [B, *, S, N]
    padding_mask: [B, *, S] or [B, *, T, S]; float masks are additive, int/bool
      masks mark ignored positions where mask == ignore_value (-> neg_inf).
    attn_mask: [T, S] additive mask shared across batch and heads.
    pv_bf16: feed the PV matmul (probs + V) to the MXU in bf16 (f32 accumulate).
    """
    lead = q.shape[:-2]
    T, N = q.shape[-2], q.shape[-1]
    S = k.shape[-2]
    BH = 1
    for d in lead:
        BH *= d
    B = lead[0] if lead else 1
    H = BH // B

    G, tq, tk, T_pad, S_pad = _choose_tiling(BH, H, T, S, N)
    n_groups = BH // G
    scale = 1.0 / math.sqrt(N)

    # ---- q / k / v: flatten, zero-pad, group G heads per grid step ---------------
    qf = q.reshape(BH, T, N)
    kf = k.reshape(BH, S, N)
    vf = v.reshape(BH, S, N)
    if T_pad > T:
        qf = jnp.pad(qf, ((0, 0), (0, T_pad - T), (0, 0)))
    if S_pad > S:
        kf = jnp.pad(kf, ((0, 0), (0, S_pad - S), (0, 0)))
        vf = jnp.pad(vf, ((0, 0), (0, S_pad - S), (0, 0)))
    qf = qf.reshape(n_groups, G, T_pad, N)
    kf = kf.reshape(n_groups, G, S_pad, N)
    vf = vf.reshape(n_groups, G, S_pad, N)

    bias_kinds, bias_arrays, bias_specs = [], [], []

    # ---- padding mask -> compact additive biases (bf16, no [BH,T,S] blow-up) -----
    col_add = None                                 # key-only additive bias (BH, S)
    if padding_mask is not None:
        pm = padding_mask
        if jnp.issubdtype(pm.dtype, jnp.floating):
            add = pm.astype(jnp.float32)
        else:
            add = jnp.where(pm == ignore_value, NEG_INF, 0.0).astype(jnp.float32)
        while add.ndim < q.ndim:                   # torch-style unsqueeze at dim 1
            add = jnp.expand_dims(add, 1)
        if add.shape[-2] == 1:
            # Key-only mask: fold into the tiny (BH, S) column bias.
            col_add = jnp.broadcast_to(add, lead + (1, S)).reshape(BH, S)
        elif all(d == 1 for d in add.shape[1:-2]):
            # Full [B(|1), 1.., T, S] mask: keep per-batch, map group -> batch in
            # the index_map instead of broadcasting across heads in HBM.
            fb = jnp.broadcast_to(add.reshape(add.shape[0], T, S), (B, T, S))
            fb = jnp.pad(fb, ((0, 0), (0, T_pad - T), (0, S_pad - S)))
            HG = H // G
            bias_kinds.append("ts")
            bias_arrays.append(fb.astype(jnp.bfloat16))
            bias_specs.append(pl.BlockSpec(
                (pl.Squeezed(), tq, tk),
                lambda g, ti, si, HG=HG: (g // HG, ti, si)))
        else:
            # Full per-head [.., T, S] mask (rare): materialize per (batch, head).
            fh = jnp.broadcast_to(add, lead + (T, S)).reshape(BH, T, S)
            fh = jnp.pad(fh, ((0, 0), (0, T_pad - T), (0, S_pad - S)))
            fh = fh.reshape(n_groups, G, T_pad, S_pad)
            bias_kinds.append("gts")
            bias_arrays.append(fh.astype(jnp.bfloat16))
            bias_specs.append(pl.BlockSpec(
                (pl.Squeezed(), G, tq, tk),
                lambda g, ti, si: (g, 0, ti, si)))

    # Padded-out key columns are masked by the same tiny column bias (replaces the
    # old in-kernel iota/compare/select that ran on every S tile).
    if col_add is not None or S_pad > S:
        if col_add is None:
            col_add = jnp.zeros((BH, S), jnp.float32)
        colv = jnp.pad(col_add, ((0, 0), (0, S_pad - S)),
                       constant_values=PAD_COL_BIAS)
        bias_kinds.append("col")
        bias_arrays.append(colv.reshape(n_groups, G, S_pad).astype(jnp.bfloat16))
        bias_specs.append(pl.BlockSpec(
            (pl.Squeezed(), G, tk), lambda g, ti, si: (g, 0, si)))

    # ---- attn mask: one shared [T_pad, S_pad] bf16 tile ---------------------------
    if attn_mask is not None:
        attn = attn_mask.astype(jnp.bfloat16)
        if T_pad > T or S_pad > S:
            attn = jnp.pad(attn, ((0, T_pad - T), (0, S_pad - S)))
        bias_kinds.append("ts")
        bias_arrays.append(attn)
        bias_specs.append(pl.BlockSpec((tq, tk), lambda g, ti, si: (ti, si)))

    # ---- pallas_call ---------------------------------------------------------------
    in_specs = bias_specs + [
        pl.BlockSpec((pl.Squeezed(), G, tq, N), lambda g, ti, si: (g, 0, ti, 0)),
        pl.BlockSpec((pl.Squeezed(), G, tk, N), lambda g, ti, si: (g, 0, si, 0)),
        pl.BlockSpec((pl.Squeezed(), G, tk, N), lambda g, ti, si: (g, 0, si, 0)),
    ]
    kernel = _make_sdpa_kernel(scale, tuple(bias_kinds), G, pv_bf16)

    grid = (n_groups, T_pad // tq, S_pad // tk)
    cp = dict(dimension_semantics=("parallel", "parallel", "arbitrary"))
    if "v6" in _device_kind():
        cp["vmem_limit_bytes"] = 64 * 1024 * 1024   # headroom for the larger v6e tiles

    out = pl.pallas_call(
        kernel,
        out_shape=jax.ShapeDtypeStruct((n_groups, T_pad, G * N), q.dtype),
        grid_spec=pltpu.PrefetchScalarGridSpec(
            num_scalar_prefetch=0,
            grid=grid,
            in_specs=in_specs,
            # Lane-dense output slab: heads packed along the last dim (G*N lanes).
            out_specs=pl.BlockSpec((pl.Squeezed(), tq, G * N),
                                   lambda g, ti, si: (g, ti, 0)),
            scratch_shapes=[
                pltpu.VMEM((G, tq, N), q.dtype),       # scaled q (hoisted)
                pltpu.VMEM((G, tq, 1), jnp.float32),   # running max m
                pltpu.VMEM((G, tq, 1), jnp.float32),   # running sum l
                pltpu.VMEM((G, tq, N), jnp.float32),   # output accumulator
            ],
        ),
        compiler_params=pltpu.CompilerParams(**cp),
    )(*bias_arrays, qf, kf, vf)

    # Undo the head->lane packing (wrapper-side layout plumbing).
    out = out.reshape(n_groups, T_pad, G, N)
    out = jnp.swapaxes(out, 1, 2).reshape(BH, T_pad, N)
    if T_pad > T:
        out = out[:, :T, :]
    return out.reshape(lead + (T, N))


def _reference(q, k, v, bias):
    hp = jax.lax.Precision.HIGHEST
    d_k = q.shape[-1]
    logits = jnp.einsum("...tn,...sn->...ts", q, k, precision=hp) / math.sqrt(d_k)
    if bias is not None:
        logits = logits + bias
    probs = jax.nn.softmax(logits, axis=-1)
    return jnp.einsum("...ts,...sn->...tn", probs, v, precision=hp)


if __name__ == "__main__":
    key = jax.random.PRNGKey(0)
    kq, kk, kv, km = jax.random.split(key, 4)

    B, H, T, S, N = 2, 3, 8, 8, 32
    q = jax.random.normal(kq, (B, H, T, N), dtype=jnp.float32)
    k = jax.random.normal(kk, (B, H, S, N), dtype=jnp.float32)
    v = jax.random.normal(kv, (B, H, S, N), dtype=jnp.float32)

    # Default path feeds the PV matmul in bf16 -> bf16-sized tolerance.
    FAST = dict(atol=2.5e-2, rtol=2.5e-2)
    # pv_bf16=False keeps the whole pipeline in f32 (exact divide, f32 MXU).
    TIGHT = dict(atol=1e-2, rtol=1e-2)

    # 1) no masks (no bias tensors at all)
    ref = _reference(q, k, v, None)
    out = jax.block_until_ready(scaled_dot_product_attention(q, k, v))
    assert out.shape == (B, H, T, N)
    assert jnp.allclose(out, ref, **FAST)
    out_f32 = jax.block_until_ready(
        scaled_dot_product_attention(q, k, v, pv_bf16=False))
    assert jnp.allclose(out_f32, ref, **TIGHT)

    # 2) int padding_mask [B, S] (zeros ignored) -> compact key-only column bias
    pad = (jax.random.uniform(km, (B, S)) > 0.3).astype(jnp.int32)
    bias = jnp.where(pad == 0, NEG_INF, 0.0)[:, None, None, :]
    ref_m = _reference(q, k, v, jnp.broadcast_to(bias, (B, H, T, S)))
    out_m = jax.block_until_ready(
        scaled_dot_product_attention(q, k, v, padding_mask=pad))
    assert jnp.allclose(out_m, ref_m, **FAST)
    out_m32 = jax.block_until_ready(
        scaled_dot_product_attention(q, k, v, padding_mask=pad, pv_bf16=False))
    assert jnp.allclose(out_m32, ref_m, **TIGHT)

    # 3) additive causal attn_mask [T, S] -> single shared bf16 tile
    causal = jnp.where(jnp.tril(jnp.ones((T, S))) == 1, 0.0,
                       NEG_INF).astype(jnp.float32)
    ref_c = _reference(q, k, v, jnp.broadcast_to(causal[None, None], (B, H, T, S)))
    out_c = jax.block_until_ready(
        scaled_dot_product_attention(q, k, v, attn_mask=causal))
    assert jnp.allclose(out_c, ref_c, **FAST)

    # 4) doctest-style 3-D input (2, 3, 8): exercises T/S padding + padded-column bias
    q3 = jax.random.normal(kq, (2, 3, 8), dtype=jnp.float32)
    ref3 = _reference(q3, q3, q3, None)
    out3 = jax.block_until_ready(scaled_dot_product_attention(q3, q3, q3))
    assert out3.shape == (2, 3, 8)
    assert jnp.allclose(out3, ref3, **FAST)

    print("KERNEL_OK")
</pallas_src>

<mosaic_0001>
module attributes {stable_mosaic.version = 11 : i64} {
  func.func @kernel(%arg0: i32, %arg1: i32, %arg2: i32, %arg3: memref<1x3x8x32xf32, #tpu.memory_space<vmem>>, %arg4: memref<1x3x8x32xf32, #tpu.memory_space<vmem>>, %arg5: memref<1x3x8x32xf32, #tpu.memory_space<vmem>>, %arg6: memref<1x8x96xf32, #tpu.memory_space<vmem>>, %arg7: memref<3x8x32xf32, #tpu.memory_space<vmem>>, %arg8: memref<3x8x1xf32, #tpu.memory_space<vmem>>, %arg9: memref<3x8x1xf32, #tpu.memory_space<vmem>>, %arg10: memref<3x8x32xf32, #tpu.memory_space<vmem>>) attributes {dimension_semantics = [#tpu.dimension_semantics<parallel>, #tpu.dimension_semantics<parallel>, #tpu.dimension_semantics<arbitrary>], iteration_bounds = array<i64: 2, 1, 1>, scalar_prefetch = 0 : i64, scratch_operands = 4 : i64, tpu.core_type = #tpu.core_type<tc>, window_params = [{transform_indices = @transform_0, window_bounds = array<i64: 1, 3, 8, 32>}, {transform_indices = @transform_1, window_bounds = array<i64: 1, 3, 8, 32>}, {transform_indices = @transform_2, window_bounds = array<i64: 1, 3, 8, 32>}, {transform_indices = @transform_3, window_bounds = array<i64: 1, 8, 96>}]} {
    %c0_i32 = arith.constant 0 : i32
    %0 = arith.cmpi eq, %arg2, %c0_i32 : i32
    %1 = arith.extui %0 : i1 to i32
    %c0_i32_0 = arith.constant 0 : i32
    %2 = arith.cmpi ne, %1, %c0_i32_0 : i32
    scf.if %2 {
      %c0_34 = arith.constant 0 : index
      %c0_35 = arith.constant 0 : index
      %c0_36 = arith.constant 0 : index
      %c0_37 = arith.constant 0 : index
      %36 = vector.load %arg3[%c0_34, %c0_35, %c0_36, %c0_37] : memref<1x3x8x32xf32, #tpu.memory_space<vmem>>, vector<1x3x8x32xf32>
      %37 = vector.shape_cast %36 : vector<1x3x8x32xf32> to vector<3x8x32xf32>
      %cst_38 = arith.constant 0.176776692 : f32
      %38 = vector.broadcast %cst_38 : f32 to vector<3x8x32xf32>
      %39 = arith.mulf %37, %38 : vector<3x8x32xf32>
      %c0_39 = arith.constant 0 : index
      %c0_40 = arith.constant 0 : index
      %c0_41 = arith.constant 0 : index
      %40 = vector.load %arg7[%c0_39, %c0_40, %c0_41] : memref<3x8x32xf32, #tpu.memory_space<vmem>>, vector<3x8x32xf32>
      tpu.vector_store %arg7[%c0_39, %c0_40, %c0_41], %39 {strides = array<i32>} : memref<3x8x32xf32, #tpu.memory_space<vmem>>, vector<3x8x32xf32>,
      %cst_42 = arith.constant -1.000000e+30 : f32
      %41 = vector.broadcast %cst_42 : f32 to vector<3x8x1xf32>
      %c0_43 = arith.constant 0 : index
      %c0_44 = arith.constant 0 : index
      %c0_45 = arith.constant 0 : index
      %42 = vector.load %arg8[%c0_43, %c0_44, %c0_45] : memref<3x8x1xf32, #tpu.memory_space<vmem>>, vector<3x8x1xf32>
      tpu.vector_store %arg8[%c0_43, %c0_44, %c0_45], %41 {strides = array<i32>} : memref<3x8x1xf32, #tpu.memory_space<vmem>>, vector<3x8x1xf32>,
      %cst_46 = arith.constant 0.000000e+00 : f32
      %43 = vector.broadcast %cst_46 : f32 to vector<3x8x1xf32>
      %c0_47 = arith.constant 0 : index
      %c0_48 = arith.constant 0 : index
      %c0_49 = arith.constant 0 : index
      %44 = vector.load %arg9[%c0_47, %c0_48, %c0_49] : memref<3x8x1xf32, #tpu.memory_space<vmem>>, vector<3x8x1xf32>
      tpu.vector_store %arg9[%c0_47, %c0_48, %c0_49], %43 {strides = array<i32>} : memref<3x8x1xf32, #tpu.memory_space<vmem>>, vector<3x8x1xf32>,
      %cst_50 = arith.constant 0.000000e+00 : f32
      %45 = vector.broadcast %cst_50 : f32 to vector<3x8x32xf32>
      %c0_51 = arith.constant 0 : index
      %c0_52 = arith.constant 0 : index
      %c0_53 = arith.constant 0 : index
      %46 = vector.load %arg10[%c0_51, %c0_52, %c0_53] : memref<3x8x32xf32, #tpu.memory_space<vmem>>, vector<3x8x32xf32>
      tpu.vector_store %arg10[%c0_51, %c0_52, %c0_53], %45 {strides = array<i32>} : memref<3x8x32xf32, #tpu.memory_space<vmem>>, vector<3x8x32xf32>,
    } else {
    }
    %c0 = arith.constant 0 : index
    %c0_1 = arith.constant 0 : index
    %c0_2 = arith.constant 0 : index
    %3 = vector.load %arg7[%c0, %c0_1, %c0_2] : memref<3x8x32xf32, #tpu.memory_space<vmem>>, vector<3x8x32xf32>
    %c0_3 = arith.constant 0 : index
    %c0_4 = arith.constant 0 : index
    %c0_5 = arith.constant 0 : index
    %c0_6 = arith.constant 0 : index
    %4 = vector.load %arg4[%c0_3, %c0_4, %c0_5, %c0_6] : memref<1x3x8x32xf32, #tpu.memory_space<vmem>>, vector<1x3x8x32xf32>
    %5 = vector.shape_cast %4 : vector<1x3x8x32xf32> to vector<3x8x32xf32>
    "tpu.trace_start"() <{level = 10 : i32, message = "gtn,gsn->gts"}> : () -> ()
    %cst = arith.constant dense<0.000000e+00> : vector<3x8x8xf32>
    %6 = tpu.matmul %3, %5, %cst {dimension_numbers = #tpu.dot_dimension_numbers<[2], [2], [1], [1], [0, 0, 0, 1, 1, 1], [0], [0]>} : vector<3x8x32xf32>, vector<3x8x32xf32>, vector<3x8x8xf32> -> vector<3x8x8xf32>
    "tpu.trace_stop"() : () -> ()
    %c0_7 = arith.constant 0 : index
    %c0_8 = arith.constant 0 : index
    %c0_9 = arith.constant 0 : index
    %7 = vector.load %arg8[%c0_7, %c0_8, %c0_9] : memref<3x8x1xf32, #tpu.memory_space<vmem>>, vector<3x8x1xf32>
    %cst_10 = arith.constant dense<0xFF800000> : vector<3x8xf32>
    %8 = vector.multi_reduction <maximumf>, %6, %cst_10 [2] : vector<3x8x8xf32> to vector<3x8xf32>
    %9 = vector.shape_cast %8 : vector<3x8xf32> to vector<3x8x1xf32>
    %10 = arith.maximumf %7, %9 : vector<3x8x1xf32>
    %11 = arith.subf %7, %10 : vector<3x8x1xf32>
    %12 = math.exp %11 : vector<3x8x1xf32>
    %13 = vector.broadcast %10 : vector<3x8x1xf32> to vector<3x8x8xf32>
    %14 = arith.subf %6, %13 : vector<3x8x8xf32>
    %15 = math.exp %14 : vector<3x8x8xf32>
    %c0_11 = arith.constant 0 : index
    %c0_12 = arith.constant 0 : index
    %c0_13 = arith.constant 0 : index
    %16 = vector.load %arg9[%c0_11, %c0_12, %c0_13] : memref<3x8x1xf32, #tpu.memory_space<vmem>>, vector<3x8x1xf32>
    %17 = arith.mulf %12, %16 : vector<3x8x1xf32>
    %cst_14 = arith.constant dense<0.000000e+00> : vector<3x8xf32>
    %18 = vector.multi_reduction <add>, %15, %cst_14 [2] : vector<3x8x8xf32> to vector<3x8xf32>
    %19 = vector.shape_cast %18 : vector<3x8xf32> to vector<3x8x1xf32>
    %20 = arith.addf %17, %19 : vector<3x8x1xf32>
    %c0_15 = arith.constant 0 : index
    %c0_16 = arith.constant 0 : index
    %c0_17 = arith.constant 0 : index
    %21 = vector.load %arg9[%c0_15, %c0_16, %c0_17] : memref<3x8x1xf32, #tpu.memory_space<vmem>>, vector<3x8x1xf32>
    tpu.vector_store %arg9[%c0_15, %c0_16, %c0_17], %20 {strides = array<i32>} : memref<3x8x1xf32, #tpu.memory_space<vmem>>, vector<3x8x1xf32>,
    %c0_18 = arith.constant 0 : index
    %c0_19 = arith.constant 0 : index
    %c0_20 = arith.constant 0 : index
    %c0_21 = arith.constant 0 : index
    %22 = vector.load %arg5[%c0_18, %c0_19, %c0_20, %c0_21] : memref<1x3x8x32xf32, #tpu.memory_space<vmem>>, vector<1x3x8x32xf32>
    %23 = vector.shape_cast %22 : vector<1x3x8x32xf32> to vector<3x8x32xf32>
    %24 = arith.truncf %15 : vector<3x8x8xf32> to vector<3x8x8xbf16>
    %25 = arith.truncf %23 : vector<3x8x32xf32> to vector<3x8x32xbf16>
    %c0_22 = arith.constant 0 : index
    %c0_23 = arith.constant 0 : index
    %c0_24 = arith.constant 0 : index
    %26 = vector.load %arg10[%c0_22, %c0_23, %c0_24] : memref<3x8x32xf32, #tpu.memory_space<vmem>>, vector<3x8x32xf32>
    %27 = vector.broadcast %12 : vector<3x8x1xf32> to vector<3x8x32xf32>
    %28 = arith.mulf %27, %26 : vector<3x8x32xf32>
    "tpu.trace_start"() <{level = 10 : i32, message = "gts,gsn->gtn"}> : () -> ()
    %cst_25 = arith.constant dense<0.000000e+00> : vector<3x8x32xf32>
    %29 = tpu.matmul %24, %25, %cst_25 {dimension_numbers = #tpu.dot_dimension_numbers<[2], [1], [1], [2], [0, 0, 0, 1, 1, 2], [0], [0]>} : vector<3x8x8xbf16>, vector<3x8x32xbf16>, vector<3x8x32xf32> -> vector<3x8x32xf32>
    "tpu.trace_stop"() : () -> ()
    %30 = arith.addf %28, %29 : vector<3x8x32xf32>
    %c0_26 = arith.constant 0 : index
    %c0_27 = arith.constant 0 : index
    %c0_28 = arith.constant 0 : index
    %31 = vector.load %arg10[%c0_26, %c0_27, %c0_28] : memref<3x8x32xf32, #tpu.memory_space<vmem>>, vector<3x8x32xf32>
    tpu.vector_store %arg10[%c0_26, %c0_27, %c0_28], %30 {strides = array<i32>} : memref<3x8x32xf32, #tpu.memory_space<vmem>>, vector<3x8x32xf32>,
    %c0_29 = arith.constant 0 : index
    %c0_30 = arith.constant 0 : index
    %c0_31 = arith.constant 0 : index
    %32 = vector.load %arg8[%c0_29, %c0_30, %c0_31] : memref<3x8x1xf32, #tpu.memory_space<vmem>>, vector<3x8x1xf32>
    tpu.vector_store %arg8[%c0_29, %c0_30, %c0_31], %10 {strides = array<i32>} : memref<3x8x1xf32, #tpu.memory_space<vmem>>, vector<3x8x1xf32>,
    %c0_i32_32 = arith.constant 0 : i32
    %33 = arith.cmpi eq, %arg2, %c0_i32_32 : i32
    %34 = arith.extui %33 : i1 to i32
    %c0_i32_33 = arith.constant 0 : i32
    %35 = arith.cmpi ne, %34, %c0_i32_33 : i32
    scf.if %35 {
      %c0_34 = arith.constant 0 : index
      %c0_35 = arith.constant 0 : index
      %c0_36 = arith.constant 0 : index
      %36 = vector.load %arg10[%c0_34, %c0_35, %c0_36] : memref<3x8x32xf32, #tpu.memory_space<vmem>>, vector<3x8x32xf32>
      %c0_37 = arith.constant 0 : index
      %c0_38 = arith.constant 0 : index
      %c0_39 = arith.constant 0 : index
      %37 = vector.load %arg9[%c0_37, %c0_38, %c0_39] : memref<3x8x1xf32, #tpu.memory_space<vmem>>, vector<3x8x1xf32>
      %cst_40 = arith.constant 1.000000e+00 : f32
      %38 = vector.broadcast %cst_40 : f32 to vector<3x8x1xf32>
      %39 = arith.divf %38, %37 : vector<3x8x1xf32>
      %40 = vector.broadcast %39 : vector<3x8x1xf32> to vector<3x8x32xf32>
      %41 = arith.mulf %36, %40 : vector<3x8x32xf32>
      %42 = vector.extract_strided_slice %41 {offsets = [0, 0, 0], sizes = [1, 8, 32], strides = [1, 1, 1]} : vector<3x8x32xf32> to vector<1x8x32xf32>
      %43 = vector.shape_cast %42 : vector<1x8x32xf32> to vector<8x32xf32>
      %44 = vector.extract_strided_slice %41 {offsets = [1, 0, 0], sizes = [1, 8, 32], strides = [1, 1, 1]} : vector<3x8x32xf32> to vector<1x8x32xf32>
      %45 = vector.shape_cast %44 : vector<1x8x32xf32> to vector<8x32xf32>
      %46 = vector.extract_strided_slice %41 {offsets = [2, 0, 0], sizes = [1, 8, 32], strides = [1, 1, 1]} : vector<3x8x32xf32> to vector<1x8x32xf32>
      %47 = vector.shape_cast %46 : vector<1x8x32xf32> to vector<8x32xf32>
      %48 = tpu.concatenate %43, %45, %47 in 1 : vector<8x32xf32>, vector<8x32xf32>, vector<8x32xf32> -> vector<8x96xf32>
      %c0_41 = arith.constant 0 : index
      %c0_42 = arith.constant 0 : index
      %c0_43 = arith.constant 0 : index
      %49 = vector.load %arg6[%c0_41, %c0_42, %c0_43] : memref<1x8x96xf32, #tpu.memory_space<vmem>>, vector<1x8x96xf32>
      %50 = vector.shape_cast %49 : vector<1x8x96xf32> to vector<8x96xf32>
      %51 = vector.shape_cast %48 : vector<8x96xf32> to vector<1x8x96xf32>
      tpu.vector_store %arg6[%c0_41, %c0_42, %c0_43], %51 {strides = array<i32>} : memref<1x8x96xf32, #tpu.memory_space<vmem>>, vector<1x8x96xf32>,
    } else {
    }
    return
  }
  func.func @transform_0(%arg0: i32, %arg1: i32, %arg2: i32) -> (i32, i32, i32, i32) {
    %c0_i32 = arith.constant 0 : i32
    %c0_i32_0 = arith.constant 0 : i32
    %c0_i32_1 = arith.constant 0 : i32
    return %arg0, %c0_i32, %arg1, %c0_i32_0 : i32, i32, i32, i32
  }
  func.func @transform_1(%arg0: i32, %arg1: i32, %arg2: i32) -> (i32, i32, i32, i32) {
    %c0_i32 = arith.constant 0 : i32
    %c0_i32_0 = arith.constant 0 : i32
    %c0_i32_1 = arith.constant 0 : i32
    return %arg0, %c0_i32, %arg2, %c0_i32_0 : i32, i32, i32, i32
  }
  func.func @transform_2(%arg0: i32, %arg1: i32, %arg2: i32) -> (i32, i32, i32, i32) {
    %c0_i32 = arith.constant 0 : i32
    %c0_i32_0 = arith.constant 0 : i32
    %c0_i32_1 = arith.constant 0 : i32
    return %arg0, %c0_i32, %arg2, %c0_i32_0 : i32, i32, i32, i32
  }
  func.func @transform_3(%arg0: i32, %arg1: i32, %arg2: i32) -> (i32, i32, i32) {
    %c0_i32 = arith.constant 0 : i32
    %c0_i32_0 = arith.constant 0 : i32
    return %arg0, %arg1, %c0_i32 : i32, i32, i32
  }
}

</mosaic_0001>

<bundles_post_ra>
// kernel: scaled_dot_product_attention.1
= control target key start
LH: loop header
LB: loop body
LE: loop exit
PB: predicated region body
PF: predicated region fallthrough
CT: control target
= control target key end

     0   :  { %8 = vsyncpa [#allocation7], 0  ;;  %s1559_s0 = inlined_call_operand.hbm [shape: f32[2,3,8,32], index: 0, kind: input, shape index: {}]   ;;  %s1560_s1 = inlined_call_operand.hbm [shape: f32[2,3,8,32], index: 1, kind: input, shape index: {}]   ;;  %s1561_s2 = inlined_call_operand.hbm [shape: f32[2,3,8,32], index: 2, kind: input, shape index: {}]   ;;  %s1562_s3 = inlined_call_operand.vmem [shape: f32[2,8,96], index: 3, kind: output, shape index: {}]  }
   0x1   :  { %10 = vsyncpa [#allocation7 + $0x1], 0 }
   0x2   :  { %11 = vsyncpa [#allocation9], 0 }
   0x3   :  { %13 = vsyncpa [#allocation9 + $0x1], 0  ;;  %s1328_s12 = smov 0   ;;  %s1330_s13 = smov 0  }
   0x4   :  { %s1332_s14 = smov 0   ;;  %s1334_s15 = smov 0  }
   0x5   :  { %s1336_s16 = smov 0   ;;  %s1338_s17 = smov 0  }
   0x6 LB: > { %s1563_s18 = sadd.s32 4294967295, %s1295_s17   ;;  %s38_s19 = sadd.s32 1, %s1291_s16  ;;  %s1295_s17 = sphi %s1338_s17, %s19_s17   ;;  %s1291_s16 = sphi %s1336_s16, %s1572_s16   ;;  %s1287_s15 = sphi %s1334_s15, %s1571_s15   ;;  %s1283_s14 = sphi %s1332_s14, %s1570_s14   ;;  %s1279_s13 = sphi %s1330_s13, %s1569_s13   ;;  %s1275_s12 = sphi %s1328_s12, %s1568_s12  }
   0x7   : > { %p40_p0 = scmp.ge.s32.totalorder %s38_s19, 2  ;;  %s47_s20 = sadd.s32 1, %s1283_s14 }
   0x8   : > { %p54_p1 = scmp.ne.s32.totalorder %s1283_s14, %s1279_s13  ;;  %p55_p2 = scmp.eq.s32.totalorder %s1295_s17, 0 }
   0x9   : > { %s1574_s19 = smov (%p40_p0, %s38_s19), 0  ;;  %p60_p4 = scmp.ne.s32.totalorder %s1279_s13, %s1275_s12 }
   0xa   : > { %p56_p3 = por %p55_p2, %p54_p1  ;;  %s42_s21 = ssub.s32 %s1291_s16, %s1574_s19 }
   0xb   : > { %p61_p5 = scmp.eq.s32.totalorder %s1563_s18, 0  ;;  %p45_p6 = scmp.eq.s32.totalorder %s42_s21, 0 }
   0xc   : > { %p1080_p8 = scmp.lt.s32.totalorder %s1295_s17, 2  ;;  %s168_s24 = sand.u32 1, %s1283_s14  }
   0xd   : > { %p1369_p7 = por %p61_p5, %p60_p4  ;;  %s1379_s25 = smul.u32 384, %s1291_s16 }
   0xe   : > { %s1375_s23 = scalar_select %p45_p6, %s1283_s14, %s47_s20  }
   0xf   : > { %s1383_s26 = smul.u32 24, %s168_s24  ;;  %p1385_p9 = pnand %p1080_p8, %p56_p3 }
  0x10   : > { %s190_s28 = sand.u32 1, %s1295_s17   ;;  %s201_s4 = scalar_lea.hbm %s1560_s1, %s1379_s25 }
  0x11   : > { %s194_s5 = scalar_lea.vmem [#allocation8], %s1383_s26  ;;  %p999_p10 = scmp.ge.s32.totalorder %s1295_s17, 1 }
  0x12   : > { %s202_s6 = sshll.u32 %s194_s5, 4  ;;  %s1396_s7 = scalar_lea.sflag [#allocation9], %s190_s28  ;;  %s203_s6 = int_to_ptr.vmem [resolvable:$true] %s202_s6 }
  0x13   : > { %p1159_p11 = pneg %p1385_p9  ;;  %s1170_s8 = scalar_lea.vmem %s203_s6, 384 }
  0x14   : > { %p1171_p12 = scmp.ne.s32.totalorder %s203_s6, %s1170_s8  ;;  %s1297_s9 = smov [#allocation8]  }
  0x15   : > { %s1175_s10 = sshll.u32 %s1297_s9, 4  ;;  %s1176_s10 = int_to_ptr.vmem [resolvable:$false] %s1175_s10 }
  0x16   : > { %p1173_p13 = pnand %p1171_p12, %p1159_p11  ;;  %s1177_s11 = scalar_lea.vmem %s1176_s10, 768 }
  0x17   : > { %p1178_p1 = scmp.lt.s32.totalorder %s203_s6, %s1176_s10  ;;  %p1179_p2 = scmp.lt.s32.totalorder %s1177_s11, %s1170_s8 }
  0x18   : > { %p1174_p0 = pneg %p1173_p13 }
  0x19   : > { %p1180_p3 = por %p1179_p2, %p1178_p1 }
  0x1b   : > { %p1181_p4 = pnand %p1180_p3, %p1174_p0 }
  0x1d   : > { %1184 = shalt.err (!%p1181_p4)
}
  0x1e   : > { %s1298_s12 = smov 128   ;;  %s1299_s20 = smov 8  }
  0x1f   : > { %1076 = dma.hbm_to_vmem [thread:$0]  (!%p1385_p9), %s201_s4, 384, %s203_s6, %s1396_s7, %s1298_s12, %s1298_s12, %s1299_s20  }
  0x20   : > { %p232_p5 = scmp.lt.s32.totalorder %s1295_s17, 3  ;;  %s179_s30 = scalar_lea.hbm %s1559_s0, %s1379_s25 }
  0x21   : > { %s172_s5 = scalar_lea.vmem [#allocation6], %s1383_s26  ;;  %s169_s9 = scalar_lea.sflag [#allocation7], %s168_s24 }
  0x22   : > { %p1412_p6 = pnand %p999_p10, %p232_p5  ;;  %s180_s8 = sshll.u32 %s172_s5, 4  ;;  %s181_s8 = int_to_ptr.vmem [resolvable:$true] %s180_s8 }
  0x23   : > { %s1198_s10 = scalar_lea.vmem %s181_s8, 384  ;;  %s1300_s4 = smov [#allocation6]  }
  0x24   : > { %p1199_p8 = scmp.ne.s32.totalorder %s181_s8, %s1198_s10  ;;  %s1203_s6 = sshll.u32 %s1300_s4, 4  ;;  %s1204_s6 = int_to_ptr.vmem [resolvable:$false] %s1203_s6 }
  0x25   : > { %s1205_s11 = scalar_lea.vmem %s1204_s6, 768  ;;  %p1206_p10 = scmp.lt.s32.totalorder %s181_s8, %s1204_s6 }
  0x26   : > { %p1201_p12 = pnand %p1199_p8, %p1159_p11  ;;  %p1207_p0 = scmp.lt.s32.totalorder %s1205_s11, %s1198_s10 }
  0x28   : > { %p1202_p13 = pneg %p1201_p12  ;;  %p1208_p1 = por %p1207_p0, %p1206_p10 }
  0x2a   : > { %p1209_p2 = pnand %p1208_p1, %p1202_p13 }
  0x2c   : > { %1212 = shalt.err (!%p1209_p2)
}
  0x2d   : > { %1073 = dma.hbm_to_vmem [thread:$0]  (!%p1385_p9), %s179_s30, 384, %s181_s8, %s169_s9, %s1298_s12, %s1298_s12, %s1299_s20  }
  0x2e   : > { %s223_s29 = scalar_lea.hbm %s1561_s2, %s1379_s25  ;;  %s216_s5 = scalar_lea.vmem [#allocation10], %s1383_s26 }
  0x2f   : > { %s224_s4 = sshll.u32 %s216_s5, 4  ;;  %s1301_s6 = smov [#allocation10]   ;;  %s225_s4 = int_to_ptr.vmem [resolvable:$true] %s224_s4 }
  0x30   : > { %s1226_s10 = scalar_lea.vmem %s225_s4, 384  ;;  %s1231_s11 = sshll.u32 %s1301_s6, 4  ;;  %s1232_s11 = int_to_ptr.vmem [resolvable:$false] %s1231_s11 }
  0x31   : > { %p1227_p3 = scmp.ne.s32.totalorder %s225_s4, %s1226_s10  ;;  %s1233_s18 = scalar_lea.vmem %s1232_s11, 768 }
  0x32   : > { %p1234_p8 = scmp.lt.s32.totalorder %s225_s4, %s1232_s11  ;;  %p1235_p12 = scmp.lt.s32.totalorder %s1233_s18, %s1226_s10 }
  0x33   : > { %p1229_p4 = pnand %p1227_p3, %p1159_p11 }
  0x34   : > { %p1236_p13 = por %p1235_p12, %p1234_p8 }
  0x35   : > { %p1230_p5 = pneg %p1229_p4 }
  0x37   : > { %p1237_p10 = pnand %p1236_p13, %p1230_p5 }
  0x39   : > { %1240 = shalt.err (!%p1237_p10)
}
  0x3a   : > { %1079 = dma.hbm_to_vmem [thread:$0]  (!%p1385_p9), %s223_s29, 384, %s225_s4, %s1396_s7, %s1298_s12, %s1298_s12, %s1299_s20  }
  0x3b   : > { %236 = sbr.rel (%p1412_p6) target bundleno = 971 (0x3cb), region = 32  ;;  %s238_s25 = sand.u32 (!%p1412_p6), 1, %s1279_s13  }
  0x3c   : > { %s1448_s26 = smul.u32 (!%p1412_p6), 24, %s238_s25  ;;  %s239_s18 = scalar_lea.sflag (!%p1412_p6), [#allocation7], %s238_s25 }
  0x3e   : > { %s242_s30 = scalar_lea.vmem (!%p1412_p6), [#allocation6], %s1448_s26 }
  0x40   : > { %1266 = dma.done.wait (%p1369_p7), %s239_s18, 384  }
  0x41   : > { %1268 = vsyncadd (%p1369_p7), %s239_s18, 4294966912  ;;  %s1567_s27 = sadd.s32 4294967295, %s1295_s17   ;;  %s251_s20 = scalar_lea.vmem [#allocation8], %s1448_s26 }
  0x42   : > { %s247_s7 = sand.u32 1, %s1567_s27  }
  0x43   : > { %s248_s12 = scalar_lea.sflag [#allocation9], %s247_s7 }
  0x44   : > { %1270 = dma.done.wait (%p1369_p7), %s248_s12, 768  }
  0x45   : > { %1272 = vsyncadd (%p1369_p7), %s248_s12, 4294966528  ;;  %vm313_vm0 = vcmask 261120   ;;  %v1302_v0 = vmov 0.0   ;;  %vm1303_vm1 = vmmov 0   ;;  %v330_v1 = vld [vmem:[%s251_s20] sm:$0xff]  ;;  %v331_v2 = vld [vmem:[%s251_s20 + $0x8] sm:$0xff] }
  0x46   : > { %1024 = vmatprep.subr.mxu0 %v1302_v0  ;;  %324 = vst.msk [vmem:[#allocation5] sm:$0xff] %vm313_vm0, %v1302_v0  ;;  %325 = vst.msk [vmem:[#allocation5 + $0x8] sm:$0xff] %vm313_vm0, %v1302_v0  ;;  %1029 = vmatprep.subr.mxu1 %v1302_v0  ;;  %v307_v3 = vld [vmem:[%s242_s30] sm:$0xff]  ;;  %v308_v5 = vld [vmem:[%s242_s30 + $0x8] sm:$0xff]  ;;  %vm317_vm2 = vcmask 7168   ;;  %vm565_vm3 = vcmask 64512  }
  0x47   : > { %326 = vst.msk [vmem:[#allocation5 + $0x10] sm:$0xff] %vm313_vm0, %v1302_v0  ;;  %1026 = vmatprep.mubr.msk.f32.mxu0 %vm1303_vm1, %v1302_v0  ;;  %1031 = vmatprep.mubr.msk.f32.mxu1 %vm1303_vm1, %v1302_v0  ;;  %v310_v4 = vmul.f32 0.17677669, %v307_v3  ;;  %v309_v6 = vld [vmem:[%s242_s30 + $0x10] sm:$0xff]  ;;  %v311_v7 = vmul.f32 0.17677669, %v308_v5 }
  0x48   : > { %1025 = vmatpush3.xpose.msk.msra.mxu0 %vm313_vm0, %v330_v1  ;;  %1030 = vmatpush3.xpose.msk.msra.mxu1 %vm313_vm0, %v331_v2  ;;  %v312_v8 = vmul.f32 0.17677669, %v309_v6  ;;  %v332_v9 = vld [vmem:[%s251_s20 + $0x10] sm:$0xff]  ;;  %v1304_v13 = vmov -1e+30   ;;  %321 = vst.msk [vmem:[#allocation4] sm:$0xff] %vm317_vm2, %v1302_v0 }
  0x49   : > { %1034 = vmatprep.subr.mxu0 %v1302_v0  ;;  %1039 = vmatprep.subr.bf16.mxu1 %v1302_v0  ;;  %314 = vst.msk [vmem:[#allocation2] sm:$0xff] %vm313_vm0, %v310_v4  ;;  %315 = vst.msk [vmem:[#allocation2 + $0x8] sm:$0xff] %vm313_vm0, %v311_v7  ;;  %v1305_v23 = vmov 0   ;;  %s260_s22 = scalar_lea.vmem [#allocation10], %s1448_s26  ;;  %vm666_vm4 = vcmask 1043456   ;;  %s1306_s21 = smov 32  }
  0x4a   : > { %316 = vst.msk [vmem:[#allocation2 + $0x10] sm:$0xff] %vm313_vm0, %v312_v8  ;;  %1137 = vset.pattern.permute.xlu1 %v1305_v23  ;;  %1138 = vset.pattern.permute.xlu0 %v1305_v23  ;;  %v633_v36 = vld [vmem:[%s260_s22] sm:$0xff]  ;;  %v634_v39 = vld [vmem:[%s260_s22 + $0x8] sm:$0xff]  ;;  %v635_v42 = vld [vmem:[%s260_s22 + $0x10] sm:$0xff]  ;;  %s1307_s8 = smov 64   ;;  %p295_p7 = scmp.lt.s32.totalorder %s1287_s15, 1 }
  0x4b   : > { %318 = vst.msk [vmem:[#allocation3] sm:$0xff] %vm317_vm2, %v1304_v13  ;;  %319 = vst.msk [vmem:[#allocation3 + $0x8] sm:$0xff] %vm317_vm2, %v1304_v13  ;;  %v639_v37 = vpack.c.bf16 %v633_v36, %v633_v36  ;;  %v640_v40 = vpack.c.bf16 %v634_v39, %v634_v39  ;;  %v641_v43 = vpack.c.bf16 %v635_v42, %v635_v42  ;;  %vm853_vm5 = vcmask 523264  }
  0x4c   : > { %320 = vst.msk [vmem:[#allocation3 + $0x10] sm:$0xff] %vm317_vm2, %v1304_v13  ;;  %322 = vst.msk [vmem:[#allocation4 + $0x8] sm:$0xff] %vm317_vm2, %v1302_v0  ;;  %s1576_s15 = smov (!%p295_p7, %s1287_s15), 1  ;;  %vm855_vm6 = vcmask 785408  }
  0x4d   : > { %323 = vst.msk [vmem:[#allocation4 + $0x10] sm:$0xff] %vm317_vm2, %v1302_v0  ;;  %v668_v38 = vsel %vm666_vm4, %v639_v37, 0  ;;  %v714_v41 = vsel %vm666_vm4, %v640_v40, 0  ;;  %v760_v44 = vsel %vm666_vm4, %v641_v43, 0  ;;  %s1000_s9 = sshll.u32 %s1576_s15, 3 }
  0x4e   : > { %s301_s29 = scalar_lea.vmem %s1562_s3, %s1000_s9 }
  0x50   : > { %v327_v10 = vld [vmem:[#allocation2] sm:$0xff]  ;;  %v328_v11 = vld [vmem:[#allocation2 + $0x8] sm:$0xff] }
  0x51   : > { %1027 = vmatmul.mubr.msk.f32.vlgmr.msra.gmra.mxu0 %vm313_vm0, %v327_v10  ;;  %1032 = vmatmul.mubr.msk.f32.vlgmr.msra.gmra.mxu1 %vm313_vm0, %v328_v11  ;;  %v329_v12 = vld [vmem:[#allocation2 + $0x10] sm:$0xff] }
  0x52   : > { %1035 = vmatpush3.xpose.msk.msra.mxu0 %vm313_vm0, %v332_v9  ;;  %1036 = vmatprep.mubr.msk.f32.mxu0 %vm1303_vm1, %v1302_v0  ;;  %v1504_v24 = vld [vmem:[#allocation3] sm:$0xff]  ;;  %v563_v27 = vld [vmem:[#allocation3 + $0x8] sm:$0xff]  ;;  %v611_v10 = vld [vmem:[#allocation4] sm:$0xff] }
  0x53   : > { %1041 = vmatprep.mubr.msk.bf16.mxu1 %vm1303_vm1, %v1302_v0  ;;  %1045 = vmatprep.subr.bf16.mxu0 %v1302_v0  ;;  %v564_v28 = vld [vmem:[#allocation3 + $0x10] sm:$0xff]  ;;  %v612_v4 = vld [vmem:[#allocation4 + $0x8] sm:$0xff] }
  0x54   : > { %1040 = vmatpush3.bf16.msra.mxu1 %v668_v38  ;;  %v613_v5 = vld [vmem:[#allocation4 + $0x10] sm:$0xff] }
  0x55   : > { %1037 = vmatmul.mubr.msk.f32.vlgmr.msra.gmra.mxu0 %vm313_vm0, %v329_v12  ;;  %1051 = vmatprep.subr.bf16.mxu1 %v1302_v0 }
  0x56   : > { %1047 = vmatprep.mubr.msk.bf16.mxu0 %vm1303_vm1, %v1302_v0  ;;  %1046 = vmatpush3.bf16.msra.mxu0 %v714_v41 }
 0x111   : > { %v406_v14 = vpop.f32.mrf.mxu0  ;;  %v482_v15 = vpop.f32.mrf.mxu1 }
 0x112   : > { %v566_v16 = vsel %vm565_vm3, %v406_v14, -inf  ;;  %v569_v19 = vsel %vm565_vm3, %v482_v15, -inf }
 0x113   : > { %567 = vmax.xlane.f32.xlu0 %v566_v16  ;;  %v1028_v17 = vpop.f32.mrf.mxu0  ;;  %v1033_v18 = vpop.f32.mrf.mxu1 }
 0x115   : > { %v558_v20 = vpop.f32.mrf.mxu0 }
 0x116   : > { %v572_v21 = vsel %vm565_vm3, %v558_v20, -inf }
 0x117   : > { %570 = vmax.xlane.f32.xlu0 %v569_v19  ;;  %573 = vmax.xlane.f32.xlu1 %v572_v21  ;;  %v1038_v22 = vpop.f32.mrf.mxu0 }
 0x19c   : > { %v568_v25 = vpop.xlane.xlu0 %567 }
 0x19d   : > { %v1507_v26 = vmax.f32 %v1504_v24, %v568_v25 }
 0x19f   : > { %v578_v29 = vsub.f32 %v1504_v24, %v1507_v26  ;;  %808 = vst.msk [vmem:[#allocation3] sm:$0xff] %vm317_vm2, %v1507_v26  ;;  %589 = vperm.xlu1 %1137, %v1507_v26   ;;  %v643_v24 = vld [vmem:[#allocation5 + $0x8] sm:$0xff] }
 0x1a0   : > { %v571_v30 = vpop.xlane.xlu0 %570  ;;  %v574_v31 = vpop.xlane.xlu1 %573 }
 0x1a1   : > { %v576_v32 = vmax.f32 %v563_v27, %v571_v30  ;;  %v577_v33 = vmax.f32 %v564_v28, %v574_v31  ;;  %v581_v3 = vmul.f32 1.442695, %v578_v29  ;;  %v644_v29 = vld [vmem:[#allocation5 + $0x10] sm:$0xff] }
 0x1a3   : > { %v579_v34 = vsub.f32 %v563_v27, %v576_v32  ;;  %809 = vst.msk [vmem:[#allocation3 + $0x8] sm:$0xff] %vm317_vm2, %v576_v32  ;;  %v580_v35 = vsub.f32 %v564_v28, %v577_v33  ;;  %810 = vst.msk [vmem:[#allocation3 + $0x10] sm:$0xff] %vm317_vm2, %v577_v33  ;;  %594 = vperm.xlu0 %1138, %v576_v32   ;;  %599 = vperm.xlu1 %1137, %v577_v33  }
 0x1a5   : > { %v583_v61 = vmul.f32 1.442695, %v579_v34  ;;  %v585_v1 = vmul.f32 1.442695, %v580_v35 }
 0x21a   : > { %v590_v45 = vpop.permute.xlu1 %589 }
 0x21b   : > { %v602_v46 = vsub.f32 %v406_v14, %v590_v45 }
 0x21d   : > { %v605_v47 = vmul.f32 1.442695, %v602_v46 }
 0x21e   : > { %v595_v48 = vpop.permute.xlu0 %594  ;;  %v600_v49 = vpop.permute.xlu1 %599 }
 0x21f   : > { %1139 = vpow2.f32 %v605_v47  ;;  %v603_v50 = vsub.f32 %v482_v15, %v595_v48  ;;  %v604_v51 = vsub.f32 %v558_v20, %v600_v49  ;;  %v642_v47 = vld [vmem:[#allocation5] sm:$0xff] }
 0x221   : > { %v607_v52 = vmul.f32 1.442695, %v603_v50  ;;  %v609_v53 = vmul.f32 1.442695, %v604_v51 }
 0x223   : > { %1141 = vpow2.f32 %v607_v52 }
 0x224   : > { %1143 = vpow2.f32 %v609_v53 }
 0x225   : > { %1145 = vpow2.f32 %v583_v61 }
 0x226   : > { %1147 = vpow2.f32 %v585_v1 }
 0x227   : > { %1149 = vpow2.f32 %v581_v3 }
 0x22c   : > { %v1140_v54 = vpop.eup %1139 }
 0x22d   : > { %v636_v55 = vpack.c.bf16 %v1140_v54, %v1140_v54  ;;  %v617_v62 = vsel %vm565_vm3, %v1140_v54, 0.0 }
 0x22f   : > { %1042 = vmatmul.mubr.msk.bf16.vlgmr.msra.gmra.mxu1 %vm565_vm3, %v636_v55 }
 0x230   : > { %v1142_v56 = vpop.eup %1141  ;;  %1052 = vmatpush3.bf16.msra.mxu1 %v760_v44  ;;  %1053 = vmatprep.mubr.msk.bf16.mxu1 %vm1303_vm1, %v1302_v0 }
 0x231   : > { %v1144_v57 = vpop.eup %1143  ;;  %v620_v58 = vsel %vm565_vm3, %v1142_v56, 0.0  ;;  %v637_v59 = vpack.c.bf16 %v1142_v56, %v1142_v56 }
 0x232   : > { %621 = vadd.xlane.f32.xlu1 %v620_v58  ;;  %v623_v60 = vsel %vm565_vm3, %v1144_v57, 0.0  ;;  %v638_v63 = vpack.c.bf16 %v1144_v57, %v1144_v57  ;;  %v1146_v0 = vpop.eup %1145 }
 0x233   : > { %624 = vadd.xlane.f32.xlu0 %v623_v60  ;;  %1048 = vmatmul.mubr.msk.bf16.vlgmr.msra.gmra.mxu0 %vm565_vm3, %v637_v59  ;;  %v1148_v2 = vpop.eup %1147  ;;  %v615_v6 = vmul.f32 %v1146_v0, %v612_v4 }
 0x234   : > { %v1150_v7 = vpop.eup %1149  ;;  %v616_v8 = vmul.f32 %v1148_v2, %v613_v5 }
 0x235   : > { %v614_v14 = vmul.f32 %v1150_v7, %v611_v10 }
 0x236   : > { %618 = vadd.xlane.f32.xlu1 %v617_v62 }
 0x237   : > { %1054 = vmatmul.mubr.msk.bf16.vlgmr.msra.gmra.mxu1 %vm565_vm3, %v638_v63 }
 0x247   : > { %652 = vperm.xlu1 %1137, %v1146_v0  }
 0x24b   : > { %657 = vperm.xlu1 %1137, %v1148_v2  }
 0x2bb   : > { %v622_v9 = vpop.xlane.xlu1 %621 }
 0x2bc   : > { %v625_v11 = vpop.xlane.xlu0 %624  ;;  %v627_v12 = vadd.f32 %v622_v9, %v615_v6 }
 0x2bd   : > { %v628_v13 = vadd.f32 %v625_v11, %v616_v8 }
 0x2be   : > { %631 = vst.msk [vmem:[#allocation4 + $0x8] sm:$0xff] %vm317_vm2, %v627_v12 }
 0x2bf   : > { %632 = vst.msk [vmem:[#allocation4 + $0x10] sm:$0xff] %vm317_vm2, %v628_v13  ;;  %v619_v15 = vpop.xlane.xlu1 %618 }
 0x2c0   : > { %v626_v16 = vadd.f32 %v619_v15, %v614_v14 }
 0x2c2   : > { %630 = vst.msk [vmem:[#allocation4] sm:$0xff] %vm317_vm2, %v626_v16 }
 0x2c3   : > { %v653_v23 = vpop.permute.xlu1 %652 }
 0x2c4   : > { %v661_v27 = vmul.f32 %v653_v23, %v643_v24 }
 0x2c5   : > { %v818_v17 = vld [vmem:[#allocation4 + $0x8] sm:$0xff] }
 0x2c6   : > { %v819_v18 = vld [vmem:[#allocation4 + $0x10] sm:$0xff]  ;;  %1151 = vrcp.f32 %v818_v17 }
 0x2c7   : > { %1153 = vrcp.f32 %v819_v18  ;;  %v658_v28 = vpop.permute.xlu1 %657 }
 0x2c8   : > { %v662_v35 = vmul.f32 %v658_v28, %v644_v29 }
 0x2c9   : > { %v817_v19 = vld [vmem:[#allocation4] sm:$0xff] }
 0x2ca   : > { %1155 = vrcp.f32 %v817_v19 }
 0x2d3   : > { %v1152_v20 = vpop.eup %1151 }
 0x2d4   : > { %v1154_v21 = vpop.eup %1153  ;;  %833 = vperm.xlu0 %1138, %v1152_v20  }
 0x2d5   : > { %838 = vperm.xlu1 %1137, %v1154_v21  }
 0x2d7   : > { %v1156_v22 = vpop.eup %1155 }
 0x2d9   : > { %647 = vperm.xlu1 %1137, %v1150_v7  }
 0x2dd   : > { %828 = vperm.xlu1 %1137, %v1156_v22  }
 0x2ef   : > { %v704_v25 = vpop.f32.mrf.mxu1 }
 0x2f1   : > { %v1043_v26 = vpop.f32.mrf.mxu1 }
 0x2f3   : > { %v707_v30 = vpop.f32.mrf.mxu1  ;;  %v750_v31 = vpop.f32.mrf.mxu0 }
 0x2f4   : > { %v803_v32 = vadd.f32 %v750_v31, %v661_v27 }
 0x2f5   : > { %v1044_v33 = vpop.f32.mrf.mxu1  ;;  %v1049_v34 = vpop.f32.mrf.mxu0 }
 0x2f6   : > { %806 = vst.msk [vmem:[#allocation5 + $0x8] sm:$0xff] %vm313_vm0, %v803_v32 }
 0x2f7   : > { %v753_v36 = vpop.f32.mrf.mxu0  ;;  %v796_v37 = vpop.f32.mrf.mxu1 }
 0x2f8   : > { %v804_v38 = vadd.f32 %v796_v37, %v662_v35 }
 0x2f9   : > { %v1050_v39 = vpop.f32.mrf.mxu0  ;;  %v1055_v40 = vpop.f32.mrf.mxu1 }
 0x2fa   : > { %807 = vst.msk [vmem:[#allocation5 + $0x10] sm:$0xff] %vm313_vm0, %v804_v38 }
 0x2fb   : > { %v799_v41 = vpop.f32.mrf.mxu1 }
 0x2fd   : > { %v1056_v42 = vpop.f32.mrf.mxu1  ;;  %v815_v44 = vld [vmem:[#allocation5 + $0x8] sm:$0xff] }
 0x301   : > { %v816_v48 = vld [vmem:[#allocation5 + $0x10] sm:$0xff] }
 0x34f   : > { %v834_v43 = vpop.permute.xlu0 %833 }
 0x350   : > { %v842_v45 = vmul.f32 %v834_v43, %v815_v44  ;;  %v839_v46 = vpop.permute.xlu1 %838 }
 0x351   : > { %v843_v49 = vmul.f32 %v839_v46, %v816_v48 }
 0x352   : > { %845 = vrot.lane.b32.xlu1 %v842_v45, %s1306_s21 }
 0x354   : > { %v648_v50 = vpop.permute.xlu1 %647 }
 0x355   : > { %v660_v51 = vmul.f32 %v648_v50, %v642_v47 }
 0x356   : > { %849 = vrot.lane.b32.xlu1 %v843_v49, %s1307_s8 }
 0x357   : > { %v802_v52 = vadd.f32 %v704_v25, %v660_v51 }
 0x358   : > { %v829_v53 = vpop.permute.xlu1 %828 }
 0x359   : > { %805 = vst.msk [vmem:[#allocation5] sm:$0xff] %vm313_vm0, %v802_v52 }
 0x360   : > { %v814_v54 = vld [vmem:[#allocation5] sm:$0xff] }
 0x361   : > { %v841_v56 = vmul.f32 %v829_v53, %v814_v54 }
 0x3c4   : > { %v846_v55 = vpop.permute.xlu1 %845 }
 0x3c5   : > { %v852_v57 = vsel %vm313_vm0, %v841_v56, %v846_v55 }
 0x3c8   : > { %v850_v58 = vpop.permute.xlu1 %849 }
 0x3c9   : > { %v854_v59 = vsel %vm853_vm5, %v852_v57, %v850_v58 }
 0x3ca   : > { %856 = vst.msk [vmem:[%s301_s29] sm:$0xff] %vm855_vm6, %v854_v59 }
 0x3cb PF: > { %s19_s17 = sadd.s32 1, %s1295_s17   ;;  %s1568_s12 = smov %s1279_s13 }
 0x3cc   : > { %p16_p9 = scmp.ge.s32.totalorder %s19_s17, 4   ;;  %s1569_s13 = smov %s1283_s14 }
 0x3cd   : > { %s1570_s14 = smov %s1375_s23  ;;  %s1571_s15 = smov %s1291_s16 }
 0x3ce   : > { %s1572_s16 = smov %s1574_s19  ;;  %18 = sbr.rel (!%p16_p9) target bundleno = 6 (0x6), region = 104 }
 0x3d3   :  { %882 = vsyncpa [#allocation7], 1 }
 0x3d4   :  { %884 = vsyncpa [#allocation7 + $0x1], 1 }
 0x3d5   :  { %885 = vsyncpa [#allocation9], 1 }
 0x3d6   :  { %887 = vsyncpa [#allocation9 + $0x1], 1 }

</bundles_post_ra>
